<compile_context>
chip_gen: v7x
topology: tpu7x:2x2x1
jax: 0.10.0
libtpu: 0.0.40
codegen_flags: <defaults>
</compile_context>

<pallas_src>
import jax
import jax.numpy as jnp
from jax import lax
from jax.experimental import pallas as pl
from jax.experimental.pallas import tpu as pltpu

# Module hyper-parameters (ConvLSTM.__init__ / SEBlock).
KERNEL = 3
DIL = 2
REDUCTION = 4
B, CIN, COUT, HH, WW = 2, 4, 8, 16, 16

PAD = DIL * (KERNEL - 1) // 2      # = 2 : spatial pad used for BOTH x and h storage
PAD_H = (KERNEL - 1) // 2          # = 1 : the h-conv's own padding
HP = HH + 2 * PAD                  # 20
WP = WW + 2 * PAD                  # 20
CP = 8                             # Cin zero-padded to a full sublane group
COMPW = HH * WP                    # 320 : top-left anchored flat output space
LPAD = 512                         # lane-padded storage width (>= HP*WP + max tap offset)
INV_AREA = 1.0 / (HH * WW)

# Flat lane offsets of the 9 conv taps (output anchored at flat index r*WP+c).
XOFF = tuple(WP * (kh * DIL) + kw * DIL
             for kh in range(KERNEL) for kw in range(KERNEL))          # 0..84
HOFF = tuple(WP * (kh + PAD - PAD_H) + (kw + PAD - PAD_H)
             for kh in range(KERNEL) for kw in range(KERNEL))          # 21..63


# ----------------------------------------------------------------------------
# In-kernel helpers (traced inside the Pallas bodies).
# ----------------------------------------------------------------------------
def _gate_preact(src, w, offs):
    """Fused 4-gate conv pre-activation for one stream.

    src : (CP, LPAD)  zero-padded, flattened input image (lane dim = space)
    w   : (4*COUT, 9*CP) fused, tap-major weight slab
    Builds the im2col patch (9*CP, COMPW) from 9 shifted lane slices and does
    a single MXU dot -> (4*COUT, COMPW).
    """
    patch = jnp.concatenate([src[:, o:o + COMPW] for o in offs], axis=0)
    return jnp.dot(w, patch, preferred_element_type=jnp.float32)


def _se_lrelu(h, mask, w1, b1, w2t, b2):
    """SEBlock (masked spatial mean -> fc -> relu -> fc -> sigmoid -> scale)
    followed by LeakyReLU(0.2).  All on VPU/XLU; no MXU.

    h : (COUT, COMPW), mask : (1, COMPW) selecting the 256 valid columns.
    """
    hm = h * mask                                                   # zero the pad ring
    y = jnp.sum(hm, axis=1, keepdims=True) * INV_AREA               # (COUT, 1)
    t1 = jnp.maximum(jnp.sum(w1 * y, axis=0, keepdims=True) + b1, 0.0)   # (1, mid)
    s = jax.nn.sigmoid(jnp.sum(w2t * t1, axis=1, keepdims=True) + b2)    # (COUT, 1)
    hs = hm * s
    return jnp.where(hs > 0.0, hs, 0.2 * hs)


# ----------------------------------------------------------------------------
# Pallas kernel bodies.
# ----------------------------------------------------------------------------
def _init_kernel(mask_ref, x_ref, wx_ref, bx_ref, w1_ref, b1_ref, w2t_ref, b2_ref,
                 h_ref, c_ref):
    """pair is None path: i = sig(conv_xi), o = sig(conv_xo), j = tanh(conv_xj)."""
    xv = x_ref[0]                                                   # (CP, LPAD)
    g = _gate_preact(xv, wx_ref[...], XOFF) + bx_ref[...]           # (4*COUT, COMPW)
    i = jax.nn.sigmoid(g[COUT:2 * COUT])
    o = jax.nn.sigmoid(g[2 * COUT:3 * COUT])
    j = jnp.tanh(g[3 * COUT:4 * COUT])
    c = i * j
    h = o * c
    mask = mask_ref[...]
    h = _se_lrelu(h, mask, w1_ref[...], b1_ref[...], w2t_ref[...], b2_ref[...])
    h_ref[0] = h
    c_ref[0] = c * mask


def _step_kernel(mask_ref, x_ref, hin_ref, cin_ref, wx_ref, wh_ref, b_ref,
                 w1_ref, b1_ref, w2t_ref, b2_ref, h_ref, c_ref):
    """pair given path: full ConvLSTM cell update."""
    xv = x_ref[0]                                                   # (CP, LPAD)
    hv = hin_ref[0]                                                 # (COUT, LPAD)
    g = (_gate_preact(xv, wx_ref[...], XOFF)
         + _gate_preact(hv, wh_ref[...], HOFF)
         + b_ref[...])                                              # (4*COUT, COMPW)
    f = jax.nn.sigmoid(g[0:COUT])
    i = jax.nn.sigmoid(g[COUT:2 * COUT])
    o = jax.nn.sigmoid(g[2 * COUT:3 * COUT])
    j = jnp.tanh(g[3 * COUT:4 * COUT])
    c = f * cin_ref[0] + i * j
    h = o * jnp.tanh(c)
    mask = mask_ref[...]
    h = _se_lrelu(h, mask, w1_ref[...], b1_ref[...], w2t_ref[...], b2_ref[...])
    h_ref[0] = h
    c_ref[0] = c * mask


# ----------------------------------------------------------------------------
# Wrapper: layout glue (pad / reshape / transpose only) + pallas_call.
# ----------------------------------------------------------------------------
def _full_spec(a):
    nd = a.ndim
    return pl.BlockSpec(a.shape, lambda i, _n=nd: (0,) * _n)


def _pad_flat(t):
    """(B, C, 16, 16) -> (B, C, LPAD): pad spatially by PAD, flatten, pad tail."""
    tp = jnp.pad(t, ((0, 0), (0, 0), (PAD, PAD), (PAD, PAD)))
    b_, c_, hp, wp = tp.shape
    flat = tp.reshape(b_, c_, hp * wp)
    return jnp.pad(flat, ((0, 0), (0, 0), (0, LPAD - hp * wp)))


def _unflatten(t):
    """(B, C, COMPW) top-left anchored -> (B, C, 16, 16)."""
    return t.reshape(t.shape[0], t.shape[1], HH, WP)[..., :WW]


def prep_params(p):
    """Fuse / transpose the raw parameters into kernel-friendly slabs (glue)."""
    gates = ('f', 'i', 'o', 'j')

    def fuse(prefix, cin):
        ws = jnp.stack([p['w' + prefix + g] for g in gates], axis=0)   # (4,K,K,cin,COUT)
        ws = jnp.pad(ws, ((0, 0), (0, 0), (0, 0), (0, CP - cin), (0, 0)))
        ws = jnp.transpose(ws, (0, 4, 1, 2, 3))                        # (4,COUT,K,K,CP)
        return ws.reshape(4 * COUT, KERNEL * KERNEL * CP)              # (32, 72)

    bx = jnp.concatenate([p['bx' + g] for g in gates]).reshape(4 * COUT, 1)
    bh = jnp.concatenate([p['bh' + g] for g in gates]).reshape(4 * COUT, 1)
    mask = ((jnp.arange(COMPW) % WP) < WW).astype(jnp.float32).reshape(1, COMPW)
    return dict(
        wx=fuse('x', CIN), wh=fuse('h', COUT),
        bx=bx, b_step=bx + bh,
        w1=p['w1'], b1=p['b1'].reshape(1, -1),
        w2t=p['w2'].T, b2=p['b2'].reshape(-1, 1),
        mask=mask)


def convlstm_forward(x_nchw, pair, pp):
    """x_nchw: (B, CIN, 16, 16); pair: None or (h, c) in NCHW.  Mirrors
    PyTorch's `return (h, [h, c])`."""
    b = x_nchw.shape[0]
    x8 = jnp.pad(x_nchw, ((0, 0), (0, CP - CIN), (0, 0), (0, 0)))
    x_in = _pad_flat(x8)                                             # (B, CP, LPAD)

    out_shape = (jax.ShapeDtypeStruct((b, COUT, COMPW), jnp.float32),) * 2
    out_specs = (pl.BlockSpec((1, COUT, COMPW), lambda i: (i, 0, 0)),) * 2
    cparams = pltpu.CompilerParams(dimension_semantics=("parallel",))

    if pair is None:
        args = (pp['mask'], x_in, pp['wx'], pp['bx'],
                pp['w1'], pp['b1'], pp['w2t'], pp['b2'])
        in_specs = [_full_spec(pp['mask']),
                    pl.BlockSpec((1, CP, LPAD), lambda i: (i, 0, 0))]
        in_specs += [_full_spec(a) for a in args[2:]]
        h320, c320 = pl.pallas_call(
            _init_kernel, out_shape=out_shape, grid=(b,),
            in_specs=in_specs, out_specs=out_specs,
            compiler_params=cparams,
        )(*args)
    else:
        h_prev, c_prev = pair
        h_in = _pad_flat(h_prev)                                     # (B, COUT, LPAD)
        c_in = jnp.pad(c_prev, ((0, 0), (0, 0), (0, 0), (0, WP - WW))
                       ).reshape(b, COUT, COMPW)
        args = (pp['mask'], x_in, h_in, c_in, pp['wx'], pp['wh'], pp['b_step'],
                pp['w1'], pp['b1'], pp['w2t'], pp['b2'])
        in_specs = [_full_spec(pp['mask']),
                    pl.BlockSpec((1, CP, LPAD), lambda i: (i, 0, 0)),
                    pl.BlockSpec((1, COUT, LPAD), lambda i: (i, 0, 0)),
                    pl.BlockSpec((1, COUT, COMPW), lambda i: (i, 0, 0))]
        in_specs += [_full_spec(a) for a in args[4:]]
        h320, c320 = pl.pallas_call(
            _step_kernel, out_shape=out_shape, grid=(b,),
            in_specs=in_specs, out_specs=out_specs,
            compiler_params=cparams,
        )(*args)

    h = _unflatten(h320)
    c = _unflatten(c320)
    return h, (h, c)


# ----------------------------------------------------------------------------
# Deterministic parameter init (shapes from ConvLSTM.__init__ / SEBlock).
# Conv weights kept in HWIO (K, K, Cin, Cout); NOTE: matmul inputs stay f32 to
# preserve the module's f32 numerics within the test tolerances.
# ----------------------------------------------------------------------------
def init_params(key):
    names = ['xf', 'xi', 'xo', 'xj', 'hf', 'hi', 'ho', 'hj']
    p = {}
    keys = jax.random.split(key, 2 * len(names) + 4)
    ki = 0
    for n in names:
        cin = CIN if n.startswith('x') else COUT
        p['w' + n] = 0.1 * jax.random.normal(keys[ki], (KERNEL, KERNEL, cin, COUT),
                                             jnp.float32); ki += 1
        p['b' + n] = 0.1 * jax.random.normal(keys[ki], (COUT,), jnp.float32); ki += 1
    mid = COUT // REDUCTION
    p['w1'] = 0.3 * jax.random.normal(keys[ki], (COUT, mid), jnp.float32); ki += 1
    p['b1'] = 0.1 * jax.random.normal(keys[ki], (mid,), jnp.float32); ki += 1
    p['w2'] = 0.3 * jax.random.normal(keys[ki], (mid, COUT), jnp.float32); ki += 1
    p['b2'] = 0.1 * jax.random.normal(keys[ki], (COUT,), jnp.float32); ki += 1
    return p


# ----------------------------------------------------------------------------
# Pure-JAX reference (same semantics as the PyTorch forward), NCHW.
# ----------------------------------------------------------------------------
def _conv_ref(x, w, b, dil):
    pad = dil * (KERNEL - 1) // 2
    y = lax.conv_general_dilated(x, w, (1, 1), [(pad, pad), (pad, pad)],
                                 rhs_dilation=(dil, dil),
                                 dimension_numbers=('NCHW', 'HWIO', 'NCHW'))
    return y + b[None, :, None, None]


def ref_forward(x, pair, p):
    if pair is None:
        i = jax.nn.sigmoid(_conv_ref(x, p['wxi'], p['bxi'], DIL))
        o = jax.nn.sigmoid(_conv_ref(x, p['wxo'], p['bxo'], DIL))
        j = jnp.tanh(_conv_ref(x, p['wxj'], p['bxj'], DIL))
        c = i * j
        h = o * c
    else:
        h0, c0 = pair
        f = jax.nn.sigmoid(_conv_ref(x, p['wxf'], p['bxf'], DIL) + _conv_ref(h0, p['whf'], p['bhf'], 1))
        i = jax.nn.sigmoid(_conv_ref(x, p['wxi'], p['bxi'], DIL) + _conv_ref(h0, p['whi'], p['bhi'], 1))
        o = jax.nn.sigmoid(_conv_ref(x, p['wxo'], p['bxo'], DIL) + _conv_ref(h0, p['who'], p['bho'], 1))
        j = jnp.tanh(_conv_ref(x, p['wxj'], p['bxj'], DIL) + _conv_ref(h0, p['whj'], p['bhj'], 1))
        c = f * c0 + i * j
        h = o * jnp.tanh(c)
    y = jnp.mean(h, axis=(2, 3))
    y = jnp.maximum(y @ p['w1'] + p['b1'], 0.0)
    y = jax.nn.sigmoid(y @ p['w2'] + p['b2'])
    h = h * y[:, :, None, None]
    h = jnp.where(h > 0, h, 0.2 * h)
    return h, (h, c)


if __name__ == "__main__":
    key = jax.random.PRNGKey(0)
    kp, kx1, kx2 = jax.random.split(key, 3)
    params = init_params(kp)
    pp = prep_params(params)

    # PyTorch-convention NCHW inputs for a 2-step sequence.
    x1 = jax.random.normal(kx1, (B, CIN, HH, WW), jnp.float32)
    x2 = jax.random.normal(kx2, (B, CIN, HH, WW), jnp.float32)

    # Step 1: pair is None.  Step 2: pair = (h, c) from step 1.
    h1, (h1_, c1) = convlstm_forward(x1, None, pp)
    h2, (h2_, c2) = convlstm_forward(x2, (h1, c1), pp)
    jax.block_until_ready((h2, c2))

    # Verify against a pure-JAX reference of the PyTorch forward.
    rh1, (_, rc1) = ref_forward(x1, None, params)
    rh2, (_, rc2) = ref_forward(x2, (rh1, rc1), params)
    assert jnp.allclose(h1, rh1, atol=2e-4, rtol=2e-3)
    assert jnp.allclose(c1, rc1, atol=2e-4, rtol=2e-3)
    assert jnp.allclose(h2, rh2, atol=2e-4, rtol=2e-3)
    assert jnp.allclose(c2, rc2, atol=2e-4, rtol=2e-3)

    print("KERNEL_OK")
</pallas_src>

<mosaic_0001>
module attributes {stable_mosaic.version = 11 : i64} {
  func.func @_init_kernel(%arg0: i32, %arg1: memref<1x320xf32, #tpu.memory_space<vmem>>, %arg2: memref<1x8x512xf32, #tpu.memory_space<vmem>>, %arg3: memref<32x72xf32, #tpu.memory_space<vmem>>, %arg4: memref<32x1xf32, #tpu.memory_space<vmem>>, %arg5: memref<8x2xf32, #tpu.memory_space<vmem>>, %arg6: memref<1x2xf32, #tpu.memory_space<vmem>>, %arg7: memref<8x2xf32, #tpu.memory_space<vmem>>, %arg8: memref<8x1xf32, #tpu.memory_space<vmem>>, %arg9: memref<1x8x320xf32, #tpu.memory_space<vmem>>, %arg10: memref<1x8x320xf32, #tpu.memory_space<vmem>>) attributes {dimension_semantics = [#tpu.dimension_semantics<parallel>], iteration_bounds = array<i64: 2>, scalar_prefetch = 0 : i64, scratch_operands = 0 : i64, tpu.core_type = #tpu.core_type<tc>, window_params = [{pipeline_mode = #tpu.pipeline_mode<synchronous>, transform_indices = @transform_0, window_bounds = array<i64: 1, 320>}, {transform_indices = @transform_1, window_bounds = array<i64: 1, 8, 512>}, {pipeline_mode = #tpu.pipeline_mode<synchronous>, transform_indices = @transform_2, window_bounds = array<i64: 32, 72>}, {pipeline_mode = #tpu.pipeline_mode<synchronous>, transform_indices = @transform_3, window_bounds = array<i64: 32, 1>}, {pipeline_mode = #tpu.pipeline_mode<synchronous>, transform_indices = @transform_4, window_bounds = array<i64: 8, 2>}, {pipeline_mode = #tpu.pipeline_mode<synchronous>, transform_indices = @transform_5, window_bounds = array<i64: 1, 2>}, {pipeline_mode = #tpu.pipeline_mode<synchronous>, transform_indices = @transform_6, window_bounds = array<i64: 8, 2>}, {pipeline_mode = #tpu.pipeline_mode<synchronous>, transform_indices = @transform_7, window_bounds = array<i64: 8, 1>}, {transform_indices = @transform_8, window_bounds = array<i64: 1, 8, 320>}, {transform_indices = @transform_9, window_bounds = array<i64: 1, 8, 320>}]} {
    %c0 = arith.constant 0 : index
    %c0_0 = arith.constant 0 : index
    %c0_1 = arith.constant 0 : index
    %0 = vector.load %arg2[%c0, %c0_0, %c0_1] : memref<1x8x512xf32, #tpu.memory_space<vmem>>, vector<1x8x512xf32>
    %1 = vector.shape_cast %0 : vector<1x8x512xf32> to vector<8x512xf32>
    %c0_2 = arith.constant 0 : index
    %c0_3 = arith.constant 0 : index
    %2 = vector.load %arg3[%c0_2, %c0_3] : memref<32x72xf32, #tpu.memory_space<vmem>>, vector<32x72xf32>
    %3 = vector.extract_strided_slice %1 {offsets = [0, 0], sizes = [8, 320], strides = [1, 1]} : vector<8x512xf32> to vector<8x320xf32>
    %4 = vector.extract_strided_slice %1 {offsets = [0, 2], sizes = [8, 320], strides = [1, 1]} : vector<8x512xf32> to vector<8x320xf32>
    %5 = vector.extract_strided_slice %1 {offsets = [0, 4], sizes = [8, 320], strides = [1, 1]} : vector<8x512xf32> to vector<8x320xf32>
    %6 = vector.extract_strided_slice %1 {offsets = [0, 40], sizes = [8, 320], strides = [1, 1]} : vector<8x512xf32> to vector<8x320xf32>
    %7 = vector.extract_strided_slice %1 {offsets = [0, 42], sizes = [8, 320], strides = [1, 1]} : vector<8x512xf32> to vector<8x320xf32>
    %8 = vector.extract_strided_slice %1 {offsets = [0, 44], sizes = [8, 320], strides = [1, 1]} : vector<8x512xf32> to vector<8x320xf32>
    %9 = vector.extract_strided_slice %1 {offsets = [0, 80], sizes = [8, 320], strides = [1, 1]} : vector<8x512xf32> to vector<8x320xf32>
    %10 = vector.extract_strided_slice %1 {offsets = [0, 82], sizes = [8, 320], strides = [1, 1]} : vector<8x512xf32> to vector<8x320xf32>
    %11 = vector.extract_strided_slice %1 {offsets = [0, 84], sizes = [8, 320], strides = [1, 1]} : vector<8x512xf32> to vector<8x320xf32>
    %12 = tpu.concatenate %3, %4, %5, %6, %7, %8, %9, %10, %11 in 0 : vector<8x320xf32>, vector<8x320xf32>, vector<8x320xf32>, vector<8x320xf32>, vector<8x320xf32>, vector<8x320xf32>, vector<8x320xf32>, vector<8x320xf32>, vector<8x320xf32> -> vector<72x320xf32>
    %cst = arith.constant dense<0.000000e+00> : vector<32x320xf32>
    %13 = tpu.matmul %2, %12, %cst {dimension_numbers = #tpu.dot_dimension_numbers<[1], [0], [0], [1], [0, 0, 1, 1], [], []>} : vector<32x72xf32>, vector<72x320xf32>, vector<32x320xf32> -> vector<32x320xf32>
    %c0_4 = arith.constant 0 : index
    %c0_5 = arith.constant 0 : index
    %14 = vector.load %arg4[%c0_4, %c0_5] : memref<32x1xf32, #tpu.memory_space<vmem>>, vector<32x1xf32>
    %15 = vector.broadcast %14 : vector<32x1xf32> to vector<32x320xf32>
    %16 = arith.addf %13, %15 : vector<32x320xf32>
    %17 = vector.extract_strided_slice %16 {offsets = [8, 0], sizes = [8, 320], strides = [1, 1]} : vector<32x320xf32> to vector<8x320xf32>
    %18 = arith.negf %17 : vector<8x320xf32>
    %19 = math.exp %18 : vector<8x320xf32>
    %cst_6 = arith.constant 1.000000e+00 : f32
    %20 = vector.broadcast %cst_6 : f32 to vector<8x320xf32>
    %21 = arith.addf %20, %19 : vector<8x320xf32>
    %22 = arith.divf %20, %21 : vector<8x320xf32>
    %23 = vector.extract_strided_slice %16 {offsets = [16, 0], sizes = [8, 320], strides = [1, 1]} : vector<32x320xf32> to vector<8x320xf32>
    %24 = arith.negf %23 : vector<8x320xf32>
    %25 = math.exp %24 : vector<8x320xf32>
    %cst_7 = arith.constant 1.000000e+00 : f32
    %26 = vector.broadcast %cst_7 : f32 to vector<8x320xf32>
    %27 = arith.addf %26, %25 : vector<8x320xf32>
    %28 = arith.divf %26, %27 : vector<8x320xf32>
    %29 = vector.extract_strided_slice %16 {offsets = [24, 0], sizes = [8, 320], strides = [1, 1]} : vector<32x320xf32> to vector<8x320xf32>
    %30 = math.tanh %29 : vector<8x320xf32>
    %31 = arith.mulf %22, %30 : vector<8x320xf32>
    %32 = arith.mulf %28, %31 : vector<8x320xf32>
    %c0_8 = arith.constant 0 : index
    %c0_9 = arith.constant 0 : index
    %33 = vector.load %arg1[%c0_8, %c0_9] : memref<1x320xf32, #tpu.memory_space<vmem>>, vector<1x320xf32>
    %c0_10 = arith.constant 0 : index
    %c0_11 = arith.constant 0 : index
    %34 = vector.load %arg5[%c0_10, %c0_11] : memref<8x2xf32, #tpu.memory_space<vmem>>, vector<8x2xf32>
    %c0_12 = arith.constant 0 : index
    %c0_13 = arith.constant 0 : index
    %35 = vector.load %arg6[%c0_12, %c0_13] : memref<1x2xf32, #tpu.memory_space<vmem>>, vector<1x2xf32>
    %c0_14 = arith.constant 0 : index
    %c0_15 = arith.constant 0 : index
    %36 = vector.load %arg7[%c0_14, %c0_15] : memref<8x2xf32, #tpu.memory_space<vmem>>, vector<8x2xf32>
    %c0_16 = arith.constant 0 : index
    %c0_17 = arith.constant 0 : index
    %37 = vector.load %arg8[%c0_16, %c0_17] : memref<8x1xf32, #tpu.memory_space<vmem>>, vector<8x1xf32>
    %38 = vector.broadcast %33 : vector<1x320xf32> to vector<8x320xf32>
    %39 = arith.mulf %32, %38 : vector<8x320xf32>
    %cst_18 = arith.constant dense<0.000000e+00> : vector<8xf32>
    %40 = vector.multi_reduction <add>, %39, %cst_18 [1] : vector<8x320xf32> to vector<8xf32>
    %41 = vector.shape_cast %40 : vector<8xf32> to vector<8x1xf32>
    %cst_19 = arith.constant 3.906250e-03 : f32
    %42 = vector.broadcast %cst_19 : f32 to vector<8x1xf32>
    %43 = arith.mulf %41, %42 : vector<8x1xf32>
    %44 = vector.broadcast %43 : vector<8x1xf32> to vector<8x2xf32>
    %45 = arith.mulf %34, %44 : vector<8x2xf32>
    %cst_20 = arith.constant dense<0.000000e+00> : vector<2xf32>
    %46 = vector.multi_reduction <add>, %45, %cst_20 [0] : vector<8x2xf32> to vector<2xf32>
    %47 = vector.shape_cast %46 : vector<2xf32> to vector<1x2xf32>
    %48 = arith.addf %47, %35 : vector<1x2xf32>
    %cst_21 = arith.constant 0.000000e+00 : f32
    %49 = vector.broadcast %cst_21 : f32 to vector<1x2xf32>
    %50 = arith.maximumf %48, %49 : vector<1x2xf32>
    %51 = vector.broadcast %50 : vector<1x2xf32> to vector<8x2xf32>
    %52 = arith.mulf %36, %51 : vector<8x2xf32>
    %cst_22 = arith.constant dense<0.000000e+00> : vector<8xf32>
    %53 = vector.multi_reduction <add>, %52, %cst_22 [1] : vector<8x2xf32> to vector<8xf32>
    %54 = vector.shape_cast %53 : vector<8xf32> to vector<8x1xf32>
    %55 = arith.addf %54, %37 : vector<8x1xf32>
    %56 = arith.negf %55 : vector<8x1xf32>
    %57 = math.exp %56 : vector<8x1xf32>
    %cst_23 = arith.constant 1.000000e+00 : f32
    %58 = vector.broadcast %cst_23 : f32 to vector<8x1xf32>
    %59 = arith.addf %58, %57 : vector<8x1xf32>
    %60 = arith.divf %58, %59 : vector<8x1xf32>
    %61 = vector.broadcast %60 : vector<8x1xf32> to vector<8x320xf32>
    %62 = arith.mulf %39, %61 : vector<8x320xf32>
    %cst_24 = arith.constant 0.000000e+00 : f32
    %63 = vector.broadcast %cst_24 : f32 to vector<8x320xf32>
    %64 = arith.cmpf ogt, %62, %63 : vector<8x320xf32>
    %cst_25 = arith.constant 2.000000e-01 : f32
    %65 = vector.broadcast %cst_25 : f32 to vector<8x320xf32>
    %66 = arith.mulf %65, %62 : vector<8x320xf32>
    %67 = arith.select %64, %62, %66 : vector<8x320xi1>, vector<8x320xf32>
    %c0_26 = arith.constant 0 : index
    %c0_27 = arith.constant 0 : index
    %c0_28 = arith.constant 0 : index
    %68 = vector.load %arg9[%c0_26, %c0_27, %c0_28] : memref<1x8x320xf32, #tpu.memory_space<vmem>>, vector<1x8x320xf32>
    %69 = vector.shape_cast %68 : vector<1x8x320xf32> to vector<8x320xf32>
    %70 = vector.shape_cast %67 : vector<8x320xf32> to vector<1x8x320xf32>
    tpu.vector_store %arg9[%c0_26, %c0_27, %c0_28], %70 {strides = array<i32>} : memref<1x8x320xf32, #tpu.memory_space<vmem>>, vector<1x8x320xf32>,
    %71 = vector.broadcast %33 : vector<1x320xf32> to vector<8x320xf32>
    %72 = arith.mulf %31, %71 : vector<8x320xf32>
    %c0_29 = arith.constant 0 : index
    %c0_30 = arith.constant 0 : index
    %c0_31 = arith.constant 0 : index
    %73 = vector.load %arg10[%c0_29, %c0_30, %c0_31] : memref<1x8x320xf32, #tpu.memory_space<vmem>>, vector<1x8x320xf32>
    %74 = vector.shape_cast %73 : vector<1x8x320xf32> to vector<8x320xf32>
    %75 = vector.shape_cast %72 : vector<8x320xf32> to vector<1x8x320xf32>
    tpu.vector_store %arg10[%c0_29, %c0_30, %c0_31], %75 {strides = array<i32>} : memref<1x8x320xf32, #tpu.memory_space<vmem>>, vector<1x8x320xf32>,
    return
  }
  func.func @transform_0(%arg0: i32) -> (i32, i32) {
    %c0_i32 = arith.constant 0 : i32
    %c0_i32_0 = arith.constant 0 : i32
    %c0_i32_1 = arith.constant 0 : i32
    return %c0_i32, %c0_i32_0 : i32, i32
  }
  func.func @transform_1(%arg0: i32) -> (i32, i32, i32) {
    %c0_i32 = arith.constant 0 : i32
    %c0_i32_0 = arith.constant 0 : i32
    %c0_i32_1 = arith.constant 0 : i32
    return %arg0, %c0_i32, %c0_i32_0 : i32, i32, i32
  }
  func.func @transform_2(%arg0: i32) -> (i32, i32) {
    %c0_i32 = arith.constant 0 : i32
    %c0_i32_0 = arith.constant 0 : i32
    %c0_i32_1 = arith.constant 0 : i32
    return %c0_i32, %c0_i32_0 : i32, i32
  }
  func.func @transform_3(%arg0: i32) -> (i32, i32) {
    %c0_i32 = arith.constant 0 : i32
    %c0_i32_0 = arith.constant 0 : i32
    %c0_i32_1 = arith.constant 0 : i32
    return %c0_i32, %c0_i32_0 : i32, i32
  }
  func.func @transform_4(%arg0: i32) -> (i32, i32) {
    %c0_i32 = arith.constant 0 : i32
    %c0_i32_0 = arith.constant 0 : i32
    %c0_i32_1 = arith.constant 0 : i32
    return %c0_i32, %c0_i32_0 : i32, i32
  }
  func.func @transform_5(%arg0: i32) -> (i32, i32) {
    %c0_i32 = arith.constant 0 : i32
    %c0_i32_0 = arith.constant 0 : i32
    %c0_i32_1 = arith.constant 0 : i32
    return %c0_i32, %c0_i32_0 : i32, i32
  }
  func.func @transform_6(%arg0: i32) -> (i32, i32) {
    %c0_i32 = arith.constant 0 : i32
    %c0_i32_0 = arith.constant 0 : i32
    %c0_i32_1 = arith.constant 0 : i32
    return %c0_i32, %c0_i32_0 : i32, i32
  }
  func.func @transform_7(%arg0: i32) -> (i32, i32) {
    %c0_i32 = arith.constant 0 : i32
    %c0_i32_0 = arith.constant 0 : i32
    %c0_i32_1 = arith.constant 0 : i32
    return %c0_i32, %c0_i32_0 : i32, i32
  }
  func.func @transform_8(%arg0: i32) -> (i32, i32, i32) {
    %c0_i32 = arith.constant 0 : i32
    %c0_i32_0 = arith.constant 0 : i32
    %c0_i32_1 = arith.constant 0 : i32
    return %arg0, %c0_i32, %c0_i32_0 : i32, i32, i32
  }
  func.func @transform_9(%arg0: i32) -> (i32, i32, i32) {
    %c0_i32 = arith.constant 0 : i32
    %c0_i32_0 = arith.constant 0 : i32
    %c0_i32_1 = arith.constant 0 : i32
    return %arg0, %c0_i32, %c0_i32_0 : i32, i32, i32
  }
}

</mosaic_0001>

<bundles_post_ra>
// kernel: tpu_custom_call.1
= control target key start
LH: loop header
LB: loop body
LE: loop exit
PB: predicated region body
PF: predicated region fallthrough
CT: control target
= control target key end

     0   :  { %15 = vsyncpa [#allocation3], 0  ;;  %s1753_s0 = inlined_call_operand.hbm [shape: f32[1,320], index: 0, kind: input, shape index: {}]   ;;  %s1754_s1 = inlined_call_operand.vmem [shape: f32[2,8,512], index: 1, kind: input, shape index: {}]   ;;  %s1755_s2 = inlined_call_operand.hbm [shape: f32[32,72], index: 2, kind: input, shape index: {}]   ;;  %s1756_s3 = inlined_call_operand.vmem [shape: f32[32,1], index: 3, kind: input, shape index: {}]   ;;  %s1757_s4 = inlined_call_operand.vmem [shape: f32[8,2], index: 4, kind: input, shape index: {}]   ;;  %s1758_s5 = inlined_call_operand.vmem [shape: f32[1,2], index: 5, kind: input, shape index: {}]   ;;  %s1759_s6 = inlined_call_operand.vmem [shape: f32[8,2], index: 6, kind: input, shape index: {}]   ;;  %s1760_s7 = inlined_call_operand.vmem [shape: f32[8,1], index: 7, kind: input, shape index: {}]   ;;  %s1761_s8 = inlined_call_operand.hbm [shape: f32[2,8,320], index: 8, kind: output, shape index: {0}]   ;;  %s1762_s9 = inlined_call_operand.hbm [shape: f32[2,8,320], index: 9, kind: output, shape index: {1}]  }
   0x1   :  { %16 = vsyncpa [#allocation6], 0 }
   0x2   :  { %17 = vsyncpa [#allocation4], 0 }
   0x3   :  { %19 = vsyncpa [#allocation4 + $0x1], 0 }
   0x4   :  { %20 = vsyncpa [#allocation9], 0 }
   0x5   :  { %22 = vsyncpa [#allocation9 + $0x1], 0  ;;  %s1455_s30 = smov 0   ;;  %s1457_s10 = smov 0  }
   0x6   :  { %s1459_s11 = smov 0   ;;  %s1461_s12 = smov 0  }
   0x7 LB: > { %s1476_s13 = sadd.s32 4294967295, %s1387_s12   ;;  %s969_s14 = sadd.s32 4294967294, %s1387_s12   ;;  %s1387_s12 = sphi %s1461_s12, %s1784_s12   ;;  %s1383_s11 = sphi %s1459_s11, %s1783_s11   ;;  %s1379_s10 = sphi %s1457_s10, %s1782_s10   ;;  %s1375_s30 = sphi %s1455_s30, %s1781_s30  }
   0x8   : > { %s1480_s15 = sadd.s32 1, %s1387_s12   ;;  %s208_s16 = sadd.s32 1, %s1383_s11 }
   0x9   : > { %s205_s17 = ssub.s32 %s1387_s12, %s1480_s15  ;;  %p218_p0 = scmp.ne.s32.totalorder %s1383_s11, %s1379_s10 }
   0xa   : > { %p206_p1 = scmp.eq.s32.totalorder %s205_s17, 0  ;;  %p219_p2 = scmp.eq.s32.totalorder %s1476_s13, 1 }
   0xb   : > { %p224_p3 = scmp.ne.s32.totalorder %s1379_s10, %s1375_s30  ;;  %p225_p4 = scmp.eq.s32.totalorder %s969_s14, 1 }
   0xc   : > { %s1491_s18 = scalar_select %p206_p1, %s1383_s11, %s208_s16  }
   0xd   : > { %p1493_p5 = por %p219_p2, %p218_p0  ;;  %p1497_p6 = por %p225_p4, %p224_p3 }
   0xe   : > { %1767 = sst [smem:[#allocation14_spill]] %s1491_s18  ;;  %p970_p7 = scmp.ge.s32.totalorder %s1387_s12, 1 }
   0xf   : > { %s1768_s19 = scalar_select %p1493_p5, 1, 0 }
  0x10   : > { %s1769_s20 = scalar_select %p1497_p6, 1, 0 }
  0x11   : > { %p258_p8 = scmp.lt.s32.totalorder %s1387_s12, 3  ;;  %p1763_p9 = scmp.eq.s32.totalorder %s1476_s13, 0 }
  0x12   : > { %s1389_s22 = smov [#allocation2]   ;;  %s1390_s24 = smov [#allocation5]  }
  0x13   : > { %p1504_p10 = pnand %p970_p7, %p258_p8  ;;  %s271_s23 = sshll.u32 %s1389_s22, 4  ;;  %s272_s23 = int_to_ptr.vmem [resolvable:$true] %s271_s23 }
  0x14   : > { %s281_s25 = sshll.u32 %s1390_s24, 4  ;;  %s1229_s29 = scalar_lea.hbm %s1753_s0, 48  ;;  %s1516_s25 = int_to_ptr.vmem [resolvable:$true] %s281_s25 }
  0x15   : > { %s1770_s21 = scalar_select %p1504_p10, 1, 0 }
  0x16   : > { %p1083_p11 = pneg %p1504_p10  ;;  %p1230_p13 = scmp.ne.s32.totalorder %s1753_s0, %s1229_s29 }
  0x17   : > { %p1236_p3 = scmp.lt.u32.totalorder %s1229_s29, %s1753_s0 }
  0x18   : > { %p1512_p12 = pnand %p1763_p9, %p1083_p11 }
  0x1a   : > { %p1231_p0 = pneg %p1512_p12 }
  0x1c   : > { %p1232_p1 = pnand %p1231_p0, %p1230_p13 }
  0x1e   : > { %p1233_p2 = pneg %p1232_p1 }
  0x20   : > { %p1238_p4 = pnand %p1236_p3, %p1233_p2 }
  0x22   : > { %1241 = shalt.err (!%p1238_p4)
}
  0x23   : > { %s1242_s24 = scalar_lea.vmem %s272_s23, 48  ;;  %s1249_s27 = scalar_lea.vmem %s272_s23, 64 }
  0x24   : > { %p1243_p7 = scmp.ne.s32.totalorder %s272_s23, %s1242_s24  ;;  %p1250_p9 = scmp.lt.s32.totalorder %s272_s23, %s272_s23 }
  0x25   : > { %p1251_p6 = scmp.lt.s32.totalorder %s1249_s27, %s1242_s24 }
  0x26   : > { %p1245_p8 = pnand %p1243_p7, %p1231_p0 }
  0x27   : > { %p1252_p5 = por %p1251_p6, %p1250_p9 }
  0x28   : > { %p1246_p11 = pneg %p1245_p8 }
  0x2a   : > { %p1253_p10 = pnand %p1252_p5, %p1246_p11 }
  0x2c   : > { %1256 = shalt.err (!%p1253_p10)
}
  0x2d   : > { %1086 = dma.hbm_to_vmem [thread:$0]  (!%p1512_p12), %s1753_s0, 48, %s272_s23, [#allocation3]  }
  0x2e   : > { %s1257_s17 = scalar_lea.hbm %s1755_s2, 512 }
  0x2f   : > { %p1258_p13 = scmp.ne.s32.totalorder %s1755_s2, %s1257_s17  ;;  %p1264_p9 = scmp.lt.u32.totalorder %s1257_s17, %s1755_s2 }
  0x31   : > { %p1260_p6 = pnand %p1258_p13, %p1231_p0 }
  0x33   : > { %p1261_p5 = pneg %p1260_p6 }
  0x35   : > { %p1266_p10 = pnand %p1264_p9, %p1261_p5 }
  0x37   : > { %1269 = shalt.err (!%p1266_p10)
}
  0x38   : > { %s1270_s23 = scalar_lea.vmem %s1516_s25, 512  ;;  %p1278_p4 = scmp.lt.s32.totalorder %s1516_s25, %s1516_s25 }
  0x39   : > { %p1271_p1 = scmp.ne.s32.totalorder %s1516_s25, %s1270_s23  ;;  %p1279_p7 = scmp.lt.s32.totalorder %s1270_s23, %s1270_s23 }
  0x3b   : > { %p1273_p2 = pnand %p1271_p1, %p1231_p0  ;;  %p1280_p8 = por %p1279_p7, %p1278_p4 }
  0x3d   : > { %p1274_p3 = pneg %p1273_p2 }
  0x3f   : > { %p1281_p11 = pnand %p1280_p8, %p1274_p3 }
  0x41   : > { %1284 = shalt.err (!%p1281_p11)
}
  0x42   : > { %s1391_s18 = smov 128   ;;  %s1392_s28 = smov 8  }
  0x43   : > { %1089 = dma.hbm_to_vmem [thread:$0]  (!%p1512_p12), %s1755_s2, 512, %s1516_s25, [#allocation6], %s1391_s18, %s1391_s18, %s1392_s28  }
  0x44   : > { %p1772_p13 = scmp.ne.s32.totalorder %s1770_s21, 0 }
  0x45   : > { %p1773_p0 = scmp.eq.s32.totalorder (!%p1772_p13), %s1476_s13, 0 }
  0x46   : > { %320 = sbr.rel (%p1772_p13) target bundleno = 982 (0x3d6), region = 52 }
  0x4d   : > { %1358 = dma.done.wait (%p1773_p0), [#allocation3], 48   ;;  %p1774_p6 = pmov %p1773_p0 }
  0x4e   : > { %p1775_p5 = pmov %p1773_p0 }
  0x4f   : > { %1360 = vsyncadd (%p1774_p6), [#allocation3], 4294967248 }
  0x50   : > { %1362 = dma.done.wait (%p1775_p5), [#allocation6], 512   ;;  %p1776_p9 = pmov %p1773_p0 }
  0x51   : > { %p365_p10 = scmp.lt.s32.totalorder %s1476_s13, 1  ;;  %s1393_s22 = smov 124   ;;  %v1591_v6 = vld [vmem:[#allocation5] sm:$0xff]  ;;  %vm510_vm0 = vcmask 588800   ;;  %v1400_v7 = vmov 0.0   ;;  %v489_v9 = vld [vmem:[%s1756_s3 + $0x10] sm:$0xff] }
  0x52   : > { %1364 = vsyncadd (%p1776_p9), [#allocation6], 4294966784  ;;  %s1394_s24 = smov 126   ;;  %s1395_s27 = smov 88   ;;  %587 = vmatprep.mubr.f32.mxu0 %v1400_v7  ;;  %1030 = vmatprep.mubr.msk.f32.mxu1 %vm510_vm0, %v1591_v6  ;;  %v488_v8 = vld [vmem:[%s1756_s3 + $0x8] sm:$0xff]  ;;  %v1402_v10 = vmov 0  }
  0x53   : > { %s366_s26 = scalar_select %p365_p10, %s1476_s13, 1  ;;  %1193 = vset.pattern.permute.xlu0 %v1402_v10  ;;  %1194 = vset.pattern.permute.xlu1 %v1402_v10  ;;  %v490_v11 = vld [vmem:[%s1756_s3 + $0x18] sm:$0xff]  ;;  %vm387_vm1 = vcmask 1031168   ;;  %vm411_vm2 = vcmask 719872   ;;  %vm399_vm3 = vcmask 1014784   ;;  %vm435_vm4 = vcmask 687104  }
  0x54   : > { %s1396_s23 = smov 84   ;;  %s1397_s18 = smov 86   ;;  %vm423_vm5 = vcmask 703488   ;;  %vm450_vm6 = vcmask 392192   ;;  %vm465_vm7 = vcmask 375808   ;;  %vm480_vm8 = vcmask 359424  }
  0x55   : > { %s998_s25 = sshll.u32 %s366_s26, 5  ;;  %s1398_s28 = smov 46   ;;  %vm764_vm9 = vcmask 523264   ;;  %vm771_vm10 = vcmask 15360  }
  0x56   : > { %s369_s17 = scalar_lea.vmem %s1754_s1, %s998_s25  ;;  %s1399_s14 = smov 48  }
  0x57   : > { %v1580_v0 = vld [vmem:[%s369_s17 + $0x8] sm:$0xff]  ;;  %v372_v1 = vld [vmem:[%s369_s17 + $0x10] sm:$0xff]  ;;  %v1583_v3 = vld [vmem:[%s369_s17] sm:$0xff]  ;;  %s1401_s29 = smov 44   ;;  %p1777_p1 = scmp.ne.s32.totalorder %s1768_s19, 0 }
  0x58   : > { %v1153_v2 = vpack.i.bf16 %v372_v1, %v1580_v0  ;;  %v373_v4 = vld [vmem:[%s369_s17 + $0x18] sm:$0xff]  ;;  %s1766_s17 = smul.u32 384, %s1476_s13  ;;  %s1403_s25 = smov [#allocation8]  }
  0x59   : > { %v1188_v5 = vpack.i.bf16 %v373_v4, %v1583_v3  ;;  %s1289_s16 = sshll.u32 %s1403_s25, 4  ;;  %s1290_s16 = int_to_ptr.vmem [resolvable:$false] %s1289_s16 }
  0x5a   : > { %1154 = vrot.lane.b32.xlu1 %v1153_v2, %s1393_s22  ;;  %1149 = vrot.lane.b32.xlu0 %v1153_v2, %s1394_s24  ;;  %s1291_s21 = scalar_lea.vmem %s1290_s16, 768 }
  0x5e   : > { %1159 = vrot.lane.b32.xlu1 %v1153_v2, %s1395_s27  ;;  %381 = vrot.lane.b32.xlu0 %v1583_v3, %s1394_s24  ;;  %s1636_s24 = sand.u32 1, %s1379_s10  }
  0x62   : > { %405 = vrot.lane.b32.xlu1 %v1583_v3, %s1395_s27  ;;  %393 = vrot.lane.b32.xlu0 %v1583_v3, %s1393_s22  ;;  %s1068_s27 = smul.u32 24, %s1636_s24 }
  0x66   : > { %1169 = vrot.lane.b32.xlu1 %v1153_v2, %s1396_s23  ;;  %1164 = vrot.lane.b32.xlu0 %v1153_v2, %s1397_s18 }
  0x6a   : > { %429 = vrot.lane.b32.xlu1 %v1583_v3, %s1396_s23  ;;  %417 = vrot.lane.b32.xlu0 %v1583_v3, %s1397_s18  ;;  %s1644_s23 = scalar_lea.vmem [#allocation8], %s1068_s27 }
  0x6b   : > { %s856_s22 = sshll.u32 %s1644_s23, 4  ;;  %s857_s22 = int_to_ptr.vmem [resolvable:$true] %s856_s22 }
  0x6c   : > { %s1285_s26 = scalar_lea.vmem %s857_s22, 384  ;;  %p1292_p4 = scmp.lt.s32.totalorder %s857_s22, %s1290_s16 }
  0x6d   : > { %p1286_p12 = scmp.ne.s32.totalorder %s857_s22, %s1285_s26  ;;  %p1293_p7 = scmp.lt.s32.totalorder %s1291_s21, %s1285_s26 }
  0x6e   : > { %1179 = vrot.lane.b32.xlu1 %v1153_v2, %s1398_s28  ;;  %1174 = vrot.lane.b32.xlu0 %v1153_v2, %s1399_s14 }
  0x6f   : > { %p1287_p2 = pnand %p1286_p12, %p1777_p1  ;;  %p1294_p8 = por %p1293_p7, %p1292_p4 }
  0x71   : > { %p1288_p3 = pneg %p1287_p2 }
  0x72   : > { %1189 = vrot.lane.b32.xlu1 %v1188_v5, %s1398_s28  ;;  %1184 = vrot.lane.b32.xlu0 %v1188_v5, %s1399_s14  ;;  %s1679_s14 = scalar_lea.hbm %s1762_s9, %s1766_s17 }
  0x73   : > { %p1295_p11 = pnand %p1294_p8, %p1288_p3 }
  0x76   : > { %476 = vrot.lane.b32.xlu1 %v372_v1, %s1401_s29  ;;  %474 = vrot.lane.b32.xlu0 %v1580_v0, %s1401_s29 }
  0x7a   : > { %478 = vrot.lane.b32.xlu1 %v373_v4, %s1401_s29  ;;  %472 = vrot.lane.b32.xlu0 %v1583_v3, %s1401_s29  ;;  %s828_s29 = scalar_lea.sflag [#allocation9], %s1636_s24 }
  0x7e   : > { %497 = vperm.xlu0 %1193, %v488_v8   ;;  %502 = vperm.xlu1 %1194, %v489_v9  }
  0x82   : > { %507 = vperm.xlu1 %1194, %v490_v11  }
  0xcc   : > { %v1155_v12 = vpop.permute.xlu1 %1154  ;;  %v1150_v13 = vpop.permute.xlu0 %1149 }
  0xcd   : > { %v1152_v14 = vunpack.i.h.bf16 %v1150_v13  ;;  %v1151_v15 = vunpack.i.l.bf16 %v1150_v13  ;;  %v1157_v16 = vunpack.i.h.bf16 %v1155_v12  ;;  %v1156_v17 = vunpack.i.l.bf16 %v1155_v12 }
  0xcf   : > { %v1052_v18 = vpack.c.bf16 %v1152_v14, %v372_v1  ;;  %v389_v19 = vsel %vm387_vm1, %v1151_v15, %v1152_v14  ;;  %v401_v28 = vsel %vm399_vm3, %v1156_v17, %v1157_v16 }
  0xd0   : > { %v1160_v20 = vpop.permute.xlu1 %1159  ;;  %v382_v21 = vpop.permute.xlu0 %381  ;;  %v1036_v22 = vpack.c.bf16 %v389_v19, %v1580_v0  ;;  %v377_v19 = vld [vmem:[#allocation5 + $0x18] sm:$0xff] }
  0xd1   : > { %v1162_v23 = vunpack.i.h.bf16 %v1160_v20  ;;  %v1161_v24 = vunpack.i.l.bf16 %v1160_v20  ;;  %v388_v25 = vsel %vm387_vm1, %v382_v21, %v1151_v15  ;;  %1053 = vmatprep.subr.bf16.mxu1 %v1052_v18 }
  0xd2   : > { %1037 = vmatprep.subr.bf16.mxu0 %v1036_v22  ;;  %1055 = vmatpush3.bf16.msra.mxu1 %v1052_v18  ;;  %v1038_v26 = vpack.c.bf16 %v388_v25, %v1583_v3  ;;  %v376_v18 = vld [vmem:[#allocation5 + $0x10] sm:$0xff] }
  0xd3   : > { %v1056_v27 = vpack.c.bf16 %v1162_v23, %v1157_v16  ;;  %v413_v29 = vsel %vm411_vm2, %v1161_v24, %v1162_v23 }
  0xd4   : > { %v406_v30 = vpop.permute.xlu1 %405  ;;  %1039 = vmatpush1.bf16.msra.mxu0 %v1038_v26  ;;  %v394_v31 = vpop.permute.xlu0 %393  ;;  %v1040_v32 = vpack.c.bf16 %v413_v29, %v401_v28 }
  0xd5   : > { %v412_v33 = vsel %vm411_vm2, %v406_v30, %v1161_v24  ;;  %v400_v34 = vsel %vm399_vm3, %v394_v31, %v1156_v17  ;;  %1057 = vmatprep.subr.bf16.mxu1 %v1056_v27  ;;  %v375_v17 = vld [vmem:[#allocation5 + $0x8] sm:$0xff] }
  0xd6   : > { %v1042_v35 = vpack.c.bf16 %v412_v33, %v400_v34  ;;  %1041 = vmatprep.subr.bf16.mxu0 %v1040_v32  ;;  %1059 = vmatpush3.bf16.msra.mxu1 %v1056_v27 }
  0xd8   : > { %v1170_v36 = vpop.permute.xlu1 %1169  ;;  %1043 = vmatpush1.bf16.msra.mxu0 %v1042_v35  ;;  %v1165_v37 = vpop.permute.xlu0 %1164 }
  0xd9   : > { %v1172_v38 = vunpack.i.h.bf16 %v1170_v36  ;;  %v1171_v39 = vunpack.i.l.bf16 %v1170_v36  ;;  %v1167_v40 = vunpack.i.h.bf16 %v1165_v37  ;;  %v1166_v41 = vunpack.i.l.bf16 %v1165_v37 }
  0xdb   : > { %v1060_v42 = vpack.c.bf16 %v1172_v38, %v1167_v40  ;;  %v425_v43 = vsel %vm423_vm5, %v1166_v41, %v1167_v40  ;;  %v437_v44 = vsel %vm435_vm4, %v1171_v39, %v1172_v38 }
  0xdc   : > { %v430_v45 = vpop.permute.xlu1 %429  ;;  %v418_v46 = vpop.permute.xlu0 %417  ;;  %v1044_v47 = vpack.c.bf16 %v437_v44, %v425_v43 }
  0xdd   : > { %v436_v48 = vsel %vm435_vm4, %v430_v45, %v1171_v39  ;;  %v424_v49 = vsel %vm423_vm5, %v418_v46, %v1166_v41  ;;  %1061 = vmatprep.subr.bf16.mxu1 %v1060_v42 }
  0xde   : > { %v1046_v50 = vpack.c.bf16 %v436_v48, %v424_v49  ;;  %1045 = vmatprep.subr.bf16.mxu0 %v1044_v47  ;;  %1063 = vmatpush3.bf16.msra.mxu1 %v1060_v42  ;;  %v745_v48 = vlaneseq }
  0xe0   : > { %v1180_v51 = vpop.permute.xlu1 %1179  ;;  %v1175_v52 = vpop.permute.xlu0 %1174  ;;  %1047 = vmatpush1.bf16.msra.mxu0 %v1046_v50 }
  0xe1   : > { %v1182_v53 = vunpack.i.h.bf16 %v1180_v51  ;;  %v1181_v54 = vunpack.i.l.bf16 %v1180_v51  ;;  %v1177_v55 = vunpack.i.h.bf16 %v1175_v52  ;;  %v1176_v56 = vunpack.i.l.bf16 %v1175_v52 }
  0xe3   : > { %v452_v57 = vsel %vm450_vm6, %v1176_v56, %v1177_v55  ;;  %v467_v58 = vsel %vm465_vm7, %v1181_v54, %v1182_v53 }
  0xe4   : > { %v1190_v59 = vpop.permute.xlu1 %1189  ;;  %v1185_v60 = vpop.permute.xlu0 %1184  ;;  %v1048_v61 = vpack.c.bf16 %v467_v58, %v452_v57 }
  0xe5   : > { %v1192_v62 = vunpack.i.h.bf16 %v1190_v59  ;;  %v1191_v63 = vunpack.i.l.bf16 %v1190_v59  ;;  %v1187_v0 = vunpack.i.h.bf16 %v1185_v60  ;;  %v1186_v1 = vunpack.i.l.bf16 %v1185_v60 }
  0xe6   : > { %1049 = vmatprep.subr.bf16.mxu0 %v1048_v61 }
  0xe7   : > { %v451_v2 = vsel %vm450_vm6, %v1186_v1, %v1176_v56  ;;  %v466_v3 = vsel %vm465_vm7, %v1191_v63, %v1181_v54  ;;  %v453_v4 = vsel %vm450_vm6, %v1177_v55, %v1187_v0  ;;  %v468_v5 = vsel %vm465_vm7, %v1182_v53, %v1192_v62  ;;  %v739_v63 = vld [vmem:[#allocation2] sm:$0x7] }
  0xe8   : > { %v477_v8 = vpop.permute.xlu1 %476  ;;  %v475_v9 = vpop.permute.xlu0 %474  ;;  %v1050_v10 = vpack.c.bf16 %v466_v3, %v451_v2  ;;  %v1064_v11 = vpack.c.bf16 %v468_v5, %v453_v4  ;;  %v1633_v54 = vshrl.u32 %v745_v48, 7 }
  0xe9   : > { %v482_v12 = vsel %vm480_vm8, %v475_v9, %v477_v8 }
  0xea   : > { %1051 = vmatpush1.bf16.msra.mxu0 %v1050_v10  ;;  %1065 = vmatprep.subr.bf16.mxu1 %v1064_v11  ;;  %v755_v61 = vsub.s32 2, %v1633_v54  ;;  %v747_v0 = vsub.s32 0, %v1633_v54  ;;  %v751_v2 = vsub.s32 1, %v1633_v54 }
  0xeb   : > { %539 = vmatprep.subr.mxu0 %v482_v12  ;;  %1067 = vmatpush3.bf16.msra.mxu1 %v1064_v11 }
  0xec   : > { %v479_v13 = vpop.permute.xlu1 %478  ;;  %v473_v14 = vpop.permute.xlu0 %472  ;;  %v756_v3 = vrot.slane %v739_v63, %v755_v61  ;;  %v748_v10 = vrot.slane %v739_v63, %v747_v0  ;;  %v752_v12 = vrot.slane %v739_v63, %v751_v2 }
  0xed   : > { %v481_v15 = vsel %vm480_vm8, %v473_v14, %v475_v9  ;;  %v483_v16 = vsel %vm480_vm8, %v477_v8, %v479_v13 }
  0xee   : > { %540 = vmatpush1.msra.mxu0 %v481_v15  ;;  %1028 = vmatprep.subr.mxu1 %v483_v16 }
  0xef   : > { %979 = vmatmul.mubr.msk.f32.vlgmr.msra.gmra.mrb[0].mxu0 %vm510_vm0, %v1591_v6  ;;  %1029 = vmatpush3.msra.mxu1 %v483_v16 }
  0xf0   : > { %1031 = vmatmul.mubr.msk.f32.vlgmr.msra.gmra.mrb[0].mxu1 %vm510_vm0, %v375_v17  ;;  %591 = vmatprep.mubr.f32.mxu0 %v1400_v7 }
  0xf1   : > { %1033 = vmatprep.mubr.msk.f32.mxu1 %vm510_vm0, %v376_v18 }
  0xf3   : > { %980 = vmatmul.mubr.msk.f32.gmra.mrb[2].mxu0 %vm510_vm0, %v375_v17 }
  0xf4   : > { %1034 = vmatmul.mubr.msk.f32.gmra.mrb[2].mxu1 %vm510_vm0, %v377_v19  ;;  %597 = vmatprep.mubr.f32.mxu0 %v1400_v7 }
  0xf7   : > { %981 = vmatmul.mubr.msk.f32.gmra.mrb[4].mxu0 %vm510_vm0, %v376_v18 }
  0xf8   : > { %603 = vmatprep.mubr.f32.mxu0 %v1400_v7 }
  0xfb   : > { %982 = vmatmul.mubr.msk.f32.gmra.mrb[6].mxu0 %vm510_vm0, %v377_v19 }
  0xfd   : > { %v498_v6 = vpop.permute.xlu0 %497  ;;  %v503_v27 = vpop.permute.xlu1 %502 }
 0x101   : > { %v508_v41 = vpop.permute.xlu1 %507 }
 0x1c2   : > { %v589_v20 = vpop.f32.mrb[0].mxu0 }
 0x1c3   : > { %v590_v21 = vpop.f32.mrb[1].mxu0  ;;  %v1032_v22 = vpop.f32.mrb[0].mxu1 }
 0x1c4   : > { %v681_v23 = vadd.f32 %v1032_v22, %v498_v6  ;;  %v676_v24 = vpop.f32.mrb[1].mxu1 }
 0x1c6   : > { %v989_v25 = vmul.f32 -1.442695, %v681_v23  ;;  %v593_v26 = vpop.f32.mrb[2].mxu0 }
 0x1c7   : > { %v594_v28 = vadd.f32 %v593_v26, %v498_v6  ;;  %v595_v29 = vpop.f32.mrb[3].mxu0  ;;  %v1035_v30 = vpop.f32.mrb[2].mxu1 }
 0x1c8   : > { %1195 = vpow2.f32 %v989_v25  ;;  %v596_v31 = vadd.f32 %v595_v29, %v498_v6  ;;  %v685_v32 = vpop.f32.mrb[3].mxu1  ;;  %v691_v45 = vadd.f32 %v1035_v30, %v508_v41  ;;  %v740_v30 = vld [vmem:[%s1757_s4] sm:$0xff] }
 0x1c9   : > { %v987_v33 = vmul.f32 -1.442695, %v594_v28  ;;  %v686_v34 = vadd.f32 %v685_v32, %v503_v27 }
 0x1ca   : > { %v988_v7 = vmul.f32 -1.442695, %v596_v31  ;;  %v599_v35 = vpop.f32.mrb[4].mxu0 }
 0x1cb   : > { %1197 = vpow2.f32 %v987_v33  ;;  %v992_v36 = vmul.f32 -1.442695, %v686_v34  ;;  %v600_v37 = vadd.f32 %v599_v35, %v503_v27  ;;  %v601_v38 = vpop.f32.mrb[5].mxu0 }
 0x1cc   : > { %1199 = vpow2.f32 %v988_v7  ;;  %v602_v39 = vadd.f32 %v601_v38, %v503_v27 }
 0x1cd   : > { %1201 = vpow2.f32 %v992_v36  ;;  %v990_v40 = vmul.f32 -1.442695, %v600_v37 }
 0x1ce   : > { %v991_v42 = vmul.f32 -1.442695, %v602_v39  ;;  %v605_v43 = vpop.f32.mrb[6].mxu0  ;;  %v741_v39 = vld [vmem:[%s1758_s5] sm:$0x1] }
 0x1cf   : > { %1203 = vpow2.f32 %v990_v40  ;;  %v607_v44 = vpop.f32.mrb[7].mxu0  ;;  %v606_v47 = vadd.f32 %v605_v43, %v508_v41  ;;  %v742_v43 = vld [vmem:[%s1759_s6] sm:$0xff] }
 0x1d0   : > { %1205 = vpow2.f32 %v991_v42  ;;  %v608_v50 = vadd.f32 %v607_v44, %v508_v41 }
 0x1d1   : > { %1207 = vtanh.f32 %v691_v45 }
 0x1d2   : > { %v1196_v46 = vpop.eup %1195 }
 0x1d3   : > { %v705_v49 = vadd.f32 1.0, %v1196_v46 }
 0x1d5   : > { %v1198_v51 = vpop.eup %1197  ;;  %1209 = vrcp.f32 %v705_v49 }
 0x1d6   : > { %v1200_v52 = vpop.eup %1199  ;;  %v703_v53 = vadd.f32 1.0, %v1198_v51  ;;  %1211 = vtanh.f32 %v606_v47  ;;  %v743_v47 = vld [vmem:[%s1760_s7] sm:$0xff] }
 0x1d7   : > { %v1202_v55 = vpop.eup %1201  ;;  %v704_v56 = vadd.f32 1.0, %v1200_v52  ;;  %1213 = vtanh.f32 %v608_v50 }
 0x1d8   : > { %1215 = vrcp.f32 %v703_v53  ;;  %v723_v57 = vadd.f32 1.0, %v1202_v55 }
 0x1d9   : > { %v1204_v58 = vpop.eup %1203  ;;  %1217 = vrcp.f32 %v704_v56 }
 0x1da   : > { %v1206_v59 = vpop.eup %1205  ;;  %1219 = vrcp.f32 %v723_v57  ;;  %v721_v60 = vadd.f32 1.0, %v1204_v58 }
 0x1db   : > { %v722_v62 = vadd.f32 1.0, %v1206_v59  ;;  %v1208_v1 = vpop.eup %1207 }
 0x1dc   : > { %1221 = vrcp.f32 %v721_v60 }
 0x1dd   : > { %1223 = vrcp.f32 %v722_v62 }
 0x1df   : > { %v1210_v4 = vpop.eup %1209 }
 0x1e0   : > { %v1212_v5 = vpop.eup %1211  ;;  %v735_v8 = vmul.f32 %v1210_v4, %v1208_v1 }
 0x1e1   : > { %v1214_v9 = vpop.eup %1213 }
 0x1e2   : > { %v1216_v11 = vpop.eup %1215  ;;  %v818_v13 = vmul.f32 %v756_v3, %v735_v8 }
 0x1e3   : > { %v1218_v14 = vpop.eup %1217  ;;  %v733_v15 = vmul.f32 %v1216_v11, %v1212_v5 }
 0x1e4   : > { %v1220_v16 = vpop.eup %1219  ;;  %v734_v17 = vmul.f32 %v1218_v14, %v1214_v9  ;;  %821 = vst.msk [vmem:[%s1644_s23 + $0x10] sm:$0xff] %vm764_vm9, %v818_v13 }
 0x1e5   : > { %v738_v18 = vmul.f32 %v1220_v16, %v735_v8  ;;  %v816_v19 = vmul.f32 %v748_v10, %v733_v15 }
 0x1e6   : > { %v1222_v6 = vpop.eup %1221  ;;  %v817_v20 = vmul.f32 %v752_v12, %v734_v17 }
 0x1e7   : > { %v1224_v21 = vpop.eup %1223  ;;  %v736_v22 = vmul.f32 %v1222_v6, %v733_v15  ;;  %819 = vst [vmem:[%s1644_s23] sm:$0xff] %v816_v19  ;;  %v1652_v25 = vmul.f32 %v756_v3, %v738_v18 }
 0x1e8   : > { %v737_v23 = vmul.f32 %v1224_v21, %v734_v17  ;;  %820 = vst [vmem:[%s1644_s23 + $0x8] sm:$0xff] %v817_v20 }
 0x1e9   : > { %v1650_v24 = vmul.f32 %v748_v10, %v736_v22  ;;  %v765_v28 = vsel %vm764_vm9, %v1652_v25, 0.0 }
 0x1ea   : > { %v1654_v26 = vmul.f32 %v752_v12, %v737_v23 }
 0x1ec   : > { %v763_v27 = vadd.f32 %v1654_v26, %v1650_v24 }
 0x1ee   : > { %v766_v29 = vadd.f32 %v765_v28, %v763_v27 }
 0x1f0   : > { %767 = vadd.xlane.f32.xlu0 %v766_v29 }
 0x27d   : > { %v768_v31 = vpop.xlane.xlu0 %767 }
 0x27e   : > { %v769_v32 = vmul.f32 0.00390625, %v768_v31 }
 0x280   : > { %v770_v33 = vmul.f32 %v769_v32, %v740_v30 }
 0x282   : > { %v772_v34 = vsel %vm771_vm10, %v770_v33, 0.0 }
 0x283   : > { %v773_v7 = vrot.slane %v772_v34, 4 }
 0x285   : > { %v774_v35 = vadd.f32 %v773_v7, %v772_v34 }
 0x287   : > { %v775_v36 = vrot.slane %v774_v35, 2 }
 0x289   : > { %v776_v37 = vadd.f32 %v775_v36, %v774_v35 }
 0x28b   : > { %v777_v38 = vrot.slane %v776_v37, 1 }
 0x28d   : > { %v778_v40 = vadd.f32 %v777_v38, %v776_v37 }
 0x28f   : > { %v779_v41 = vadd.f32 %v778_v40, %v741_v39 }
 0x291   : > { %v780_v42 = vmax.f32 %v779_v41, 0.0 }
 0x293   : > { %v784_v44 = vrot.slane %v780_v42, %v747_v0 }
 0x295   : > { %v785_v45 = vmul.f32 %v784_v44, %v742_v43 }
 0x297   : > { %v786_v46 = vsel %vm771_vm10, %v785_v45, 0.0 }
 0x298   : > { %787 = vadd.xlane.f32.xlu1 %v786_v46 }
 0x325   : > { %v788_v48 = vpop.xlane.xlu1 %787 }
 0x326   : > { %v789_v49 = vadd.f32 %v788_v48, %v743_v47 }
 0x328   : > { %v993_v50 = vmul.f32 -1.442695, %v789_v49 }
 0x32a   : > { %1225 = vpow2.f32 %v993_v50 }
 0x334   : > { %v1226_v51 = vpop.eup %1225 }
 0x335   : > { %v793_v52 = vadd.f32 1.0, %v1226_v51 }
 0x337   : > { %1227 = vrcp.f32 %v793_v52 }
 0x341   : > { %v1228_v53 = vpop.eup %1227 }
 0x342   : > { %798 = vperm.xlu0 %1193, %v1228_v53  }
 0x343   : > { %1298 = shalt.err (!%p1295_p11)
}
 0x344   : > { %s1299_s23 = scalar_lea.hbm %s1679_s14, 384  ;;  %s1303_s25 = scalar_lea.hbm %s1762_s9, 768 }
 0x345   : > { %p1300_p13 = scmp.ne.s32.totalorder %s1679_s14, %s1299_s23  ;;  %p1304_p5 = scmp.lt.u32.totalorder %s1679_s14, %s1762_s9 }
 0x346   : > { %p1305_p9 = scmp.lt.u32.totalorder %s1303_s25, %s1299_s23  ;;  %p1307_p12 = scmp.lt.u32.totalorder %s1299_s23, %s1679_s14 }
 0x347   : > { %p1301_p0 = pnand %p1300_p13, %p1777_p1 }
 0x348   : > { %p1306_p10 = por %p1305_p9, %p1304_p5 }
 0x349   : > { %p1302_p6 = pneg %p1301_p0 }
 0x34a   : > { %p1308_p2 = por %p1307_p12, %p1306_p10 }
 0x34c   : > { %p1309_p3 = pnand %p1308_p2, %p1302_p6 }
 0x34e   : > { %1312 = shalt.err (!%p1309_p3)
}
 0x34f   : > { %1080 = dma.vmem_to_hbm [thread:$0]  (%p1777_p1), %s857_s22, 384, %s1679_s14, %s828_s29  }
 0x350   : > { %s357_s17 = scalar_lea.vmem [#allocation7], %s1068_s27  ;;  %s1778_s22 = smul.u32 384, %s1476_s13 }
 0x351   : > { %s842_s26 = sshll.u32 %s357_s17, 4  ;;  %s823_s27 = scalar_lea.sflag [#allocation4], %s1636_s24  ;;  %s1711_s26 = int_to_ptr.vmem [resolvable:$true] %s842_s26 }
 0x352   : > { %s1709_s21 = scalar_lea.hbm %s1761_s8, %s1778_s22  ;;  %s1313_s23 = scalar_lea.vmem %s1711_s26, 384 }
 0x353   : > { %p1314_p4 = scmp.ne.s32.totalorder %s1711_s26, %s1313_s23  ;;  %s1404_s13 = smov [#allocation7]  }
 0x354   : > { %s1317_s18 = sshll.u32 %s1404_s13, 4  ;;  %s1318_s18 = int_to_ptr.vmem [resolvable:$false] %s1317_s18 }
 0x355   : > { %p1315_p7 = pnand %p1314_p4, %p1777_p1  ;;  %s1319_s28 = scalar_lea.vmem %s1318_s18, 768 }
 0x356   : > { %p1320_p11 = scmp.lt.s32.totalorder %s1711_s26, %s1318_s18  ;;  %p1321_p13 = scmp.lt.s32.totalorder %s1319_s28, %s1313_s23 }
 0x357   : > { %p1316_p8 = pneg %p1315_p7 }
 0x358   : > { %p1322_p0 = por %p1321_p13, %p1320_p11 }
 0x35a   : > { %p1323_p6 = pnand %p1322_p0, %p1316_p8 }
 0x3c1   : > { %v799_v54 = vpop.permute.xlu0 %798 }
 0x3c2   : > { %v801_v55 = vmul.f32 %v799_v54, %v1650_v24  ;;  %v802_v56 = vmul.f32 %v799_v54, %v1654_v26  ;;  %v803_v57 = vmul.f32 %v799_v54, %v1652_v25 }
 0x3c4   : > { %vm804_vm11 = vcmp.gt.f32.partialorder %v801_v55, 0.0  ;;  %vm805_vm12 = vcmp.gt.f32.partialorder %v802_v56, 0.0  ;;  %vm806_vm13 = vcmp.gt.f32.partialorder %v803_v57, 0.0  ;;  %v807_v58 = vmul.f32 0.2, %v801_v55 }
 0x3c5   : > { %v808_v59 = vmul.f32 0.2, %v802_v56  ;;  %v809_v60 = vmul.f32 0.2, %v803_v57 }
 0x3c6   : > { %v810_v61 = vsel %vm804_vm11, %v801_v55, %v807_v58 }
 0x3c7   : > { %v811_v62 = vsel %vm805_vm12, %v802_v56, %v808_v59  ;;  %v812_v63 = vsel %vm806_vm13, %v803_v57, %v809_v60  ;;  %813 = vst [vmem:[%s357_s17] sm:$0xff] %v810_v61 }
 0x3c8   : > { %814 = vst [vmem:[%s357_s17 + $0x8] sm:$0xff] %v811_v62  ;;  %815 = vst.msk [vmem:[%s357_s17 + $0x10] sm:$0xff] %vm764_vm9, %v812_v63 }
 0x3c9   : > { %1326 = shalt.err (!%p1323_p6)
}
 0x3ca   : > { %s1327_s24 = scalar_lea.hbm %s1709_s21, 384  ;;  %s1331_s17 = scalar_lea.hbm %s1761_s8, 768 }
 0x3cb   : > { %p1328_p5 = scmp.ne.s32.totalorder %s1709_s21, %s1327_s24  ;;  %p1332_p12 = scmp.lt.u32.totalorder %s1709_s21, %s1761_s8 }
 0x3cc   : > { %p1333_p2 = scmp.lt.u32.totalorder %s1331_s17, %s1327_s24  ;;  %p1335_p4 = scmp.lt.u32.totalorder %s1327_s24, %s1709_s21 }
 0x3cd   : > { %p1329_p9 = pnand %p1328_p5, %p1777_p1 }
 0x3ce   : > { %p1334_p3 = por %p1333_p2, %p1332_p12 }
 0x3cf   : > { %p1330_p10 = pneg %p1329_p9 }
 0x3d0   : > { %p1336_p7 = por %p1335_p4, %p1334_p3 }
 0x3d2   : > { %p1337_p8 = pnand %p1336_p7, %p1330_p10 }
 0x3d4   : > { %1340 = shalt.err (!%p1337_p8)
}
 0x3d5   : > { %1079 = dma.vmem_to_hbm [thread:$0]  (%p1777_p1), %s1711_s26, 384, %s1709_s21, %s823_s27  }
 0x3d6 PF: > { %p1101_p11 = scmp.ge.s32.totalorder %s1387_s12, 2  ;;  %s868_s29 = sand.u32 1, %s1375_s30  }
 0x3d7   : > { %p1779_p13 = scmp.ne.s32.totalorder %s1769_s20, 0  ;;  %s869_s23 = scalar_lea.sflag [#allocation4], %s868_s29 }
 0x3d9   : > { %p1091_p0 = pnand %p1101_p11, %p1779_p13 }
 0x3db   : > { %1366 = dma.done.wait (!%p1091_p0), %s869_s23, 384  }
 0x3dc   : > { %1368 = vsyncadd (!%p1091_p0), %s869_s23, 4294966912  ;;  %s878_s13 = scalar_lea.sflag [#allocation9], %s868_s29 }
 0x3dd   : > { %1370 = dma.done.wait (!%p1091_p0), %s878_s13, 384  }
 0x3de   : > { %1372 = vsyncadd (!%p1091_p0), %s878_s13, 4294966912  ;;  %s1780_s19 = sld [smem:[#allocation14_spill]]  ;;  %p25_p1 = scmp.ge.s32.totalorder %s1480_s15, 4  }
 0x3df   : > { %s1781_s30 = smov %s1379_s10  ;;  %s1782_s10 = smov %s1383_s11 }
 0x3e0   : > { %s1784_s12 = smov %s1480_s15  ;;  %27 = sbr.rel (!%p25_p1) target bundleno = 7 (0x7), region = 113 }
 0x3e4   : > { %s1783_s11 = smov %s1780_s19 }
 0x3e7   :  { %883 = vsyncpa [#allocation3], 1 }
 0x3e8   :  { %885 = vsyncpa [#allocation3 + $0x1], 1 }
 0x3e9   :  { %886 = vsyncpa [#allocation6], 1 }
 0x3ea   :  { %887 = vsyncpa [#allocation4], 1 }
 0x3eb   :  { %889 = vsyncpa [#allocation4 + $0x1], 1 }
 0x3ec   :  { %890 = vsyncpa [#allocation9], 1 }
 0x3ed   :  { %892 = vsyncpa [#allocation9 + $0x1], 1 }

</bundles_post_ra>
